<compile_context>
chip_gen: v7x
topology: tpu7x:2x2x1
jax: 0.10.0
libtpu: 0.0.40
codegen_flags: <defaults>
</compile_context>

<pallas_src>
import functools

import numpy as np
import jax
import jax.numpy as jnp
from jax.experimental import pallas as pl
from jax.experimental.pallas import tpu as pltpu

LEAKY_ALPHA = 0.2      # LeakyReLU negative slope from the module
EPS = 1e-16            # same epsilon as the sparse softmax
NEG_LARGE = -1e30      # finite "-inf": avoids NaN from (-inf) - (-inf)


def _round_up(x, m):
    return (x + m - 1) // m * m


# --------------------------------------------------------------------------
# Kernel 1 (prep, row-tiled): in one pass over h = X @ W emit
#   h_bf16 (with the "ones" column at f_out), s_src = h.a_src, s_dst = h.a_dst
# --------------------------------------------------------------------------
def prep_kernel(ones_col, x_ref, w_ref, a_src_ref, a_dst_ref,
                h_ref, s_src_ref, s_dst_ref):
    h = jnp.dot(x_ref[...], w_ref[...], preferred_element_type=jnp.float32)
    # per-node score contributions (VPU mul + lane reduce), hoisted out of the
    # N^2 attention loop
    s_src_ref[...] = jnp.sum(h * a_src_ref[...], axis=-1, keepdims=True)
    s_dst_ref[...] = jnp.sum(h * a_dst_ref[...], axis=-1, keepdims=True).T
    # ones column so p @ h also yields row-sum(p) (softmax denominator) for free
    col = jax.lax.broadcasted_iota(jnp.int32, h.shape, 1)
    h = jnp.where(col == ones_col, 1.0, h)
    h_ref[...] = h.astype(h_ref.dtype)          # bf16 HBM stream


# --------------------------------------------------------------------------
# Kernel 2: masked online-softmax attention + aggregation
#   grid = (row tiles over source nodes [parallel], col tiles over dst nodes)
# --------------------------------------------------------------------------
def gat_attn_kernel(ones_col, hk_ref, s_src_ref, s_dst_ref, adj_ref, out_ref,
                    m_sc, acc_sc):
    j = pl.program_id(1)

    @pl.when(j == 0)
    def _():
        m_sc[...] = jnp.full(m_sc.shape, NEG_LARGE, m_sc.dtype)
        acc_sc[...] = jnp.zeros(acc_sc.shape, acc_sc.dtype)

    # edge logits for this (row tile, col tile): leakyrelu(s_src_i + s_dst_j)
    e = s_src_ref[...] + s_dst_ref[...]               # (TQ,1)+(1,TK) -> (TQ,TK)
    e = jnp.maximum(e, LEAKY_ALPHA * e)               # LeakyReLU
    e = jnp.where(adj_ref[...] > 0, e, NEG_LARGE)     # int8 adjacency mask

    # online (flash-style) masked softmax update; masked p underflows to 0
    # once m_new is finite, and fully-masked prefixes are wiped by corr = 0.
    m_new = jnp.maximum(m_sc[...], jnp.max(e, axis=-1, keepdims=True))
    corr = jnp.exp(m_sc[...] - m_new)                 # in [0, 1]
    p = jnp.exp(e - m_new)                            # (TQ, TK)
    acc_sc[...] = corr * acc_sc[...] + jnp.dot(
        p.astype(jnp.bfloat16), hk_ref[...], preferred_element_type=jnp.float32)
    m_sc[...] = m_new

    @pl.when(j == pl.num_programs(1) - 1)
    def _():
        denom = acc_sc[:, ones_col:ones_col + 1]      # row-sum(p) via ones column
        inv = pl.reciprocal(denom + EPS)              # exact (parity with ref)
        out_ref[...] = (acc_sc[...] * inv).astype(out_ref.dtype)


# --------------------------------------------------------------------------
# Wrapper: padding + two pallas_calls
# --------------------------------------------------------------------------
def gat_onehead_forward(x, weight, a, adj_dense, *, tile_q=512, tile_k=512):
    """Single-head GAT forward. adj_dense: dense 0/1 mask, row=edge[0], col=edge[1].

    tile_q/tile_k should be power-of-two multiples of 128.
    """
    n, f_in = x.shape
    f_out = weight.shape[1]

    # lane-dense feature padding (+1 column reserved for the ones trick)
    f_pad = _round_up(f_out + 1, 128)

    # clamp tiles to the (padded) problem size
    n_base = _round_up(n, 128)
    tile_q = min(tile_q, n_base)
    tile_k = min(tile_k, n_base)
    n_pad = _round_up(n, max(tile_q, tile_k))
    # keep >= 2 row tiles so the "parallel" axis can shard across 2 TCs (v7x)
    if n_pad // tile_q < 2 and tile_q >= 256:
        tile_q //= 2

    x_p = jnp.zeros((n_pad, f_in), jnp.float32).at[:n, :].set(x.astype(jnp.float32))
    w_p = jnp.zeros((f_in, f_pad), jnp.float32).at[:, :f_out].set(
        weight.astype(jnp.float32))
    a_src = jnp.zeros((1, f_pad), jnp.float32).at[:, :f_out].set(
        a[:, :f_out].astype(jnp.float32))
    a_dst = jnp.zeros((1, f_pad), jnp.float32).at[:, :f_out].set(
        a[:, f_out:].astype(jnp.float32))
    adj_i8 = jnp.zeros((n_pad, n_pad), jnp.int8).at[:n, :n].set(
        (adj_dense > 0).astype(jnp.int8))
    # TODO(synk): for v5e (HBM-bound) the adjacency could be bit-packed 8 cols/byte.

    # ---- prep: h (bf16, ones col), s_src, s_dst in one row-tiled pass ----
    h_bf16, s_src, s_dst = pl.pallas_call(
        functools.partial(prep_kernel, f_out),
        out_shape=(
            jax.ShapeDtypeStruct((n_pad, f_pad), jnp.bfloat16),
            jax.ShapeDtypeStruct((n_pad, 1), jnp.float32),
            jax.ShapeDtypeStruct((1, n_pad), jnp.float32),
        ),
        grid_spec=pltpu.PrefetchScalarGridSpec(
            num_scalar_prefetch=0,
            grid=(n_pad // tile_q,),
            in_specs=[
                pl.BlockSpec((tile_q, f_in), lambda i: (i, 0)),
                pl.BlockSpec((f_in, f_pad), lambda i: (0, 0)),
                pl.BlockSpec((1, f_pad), lambda i: (0, 0)),
                pl.BlockSpec((1, f_pad), lambda i: (0, 0)),
            ],
            out_specs=[
                pl.BlockSpec((tile_q, f_pad), lambda i: (i, 0)),
                pl.BlockSpec((tile_q, 1), lambda i: (i, 0)),
                pl.BlockSpec((1, tile_q), lambda i: (0, i)),
            ],
        ),
        compiler_params=pltpu.CompilerParams(dimension_semantics=("parallel",)),
    )(x_p, w_p, a_src, a_dst)

    # ---- masked online-softmax attention over (row tile, col tile) grid ----
    out_p = pl.pallas_call(
        functools.partial(gat_attn_kernel, f_out),
        out_shape=jax.ShapeDtypeStruct((n_pad, f_pad), jnp.float32),
        grid_spec=pltpu.PrefetchScalarGridSpec(
            num_scalar_prefetch=0,
            grid=(n_pad // tile_q, n_pad // tile_k),
            in_specs=[
                pl.BlockSpec((tile_k, f_pad), lambda i, j: (j, 0)),   # h (dst/value)
                pl.BlockSpec((tile_q, 1), lambda i, j: (i, 0)),       # s_src (resident)
                pl.BlockSpec((1, tile_k), lambda i, j: (0, j)),       # s_dst
                pl.BlockSpec((tile_q, tile_k), lambda i, j: (i, j)),  # adjacency (int8)
            ],
            out_specs=pl.BlockSpec((tile_q, f_pad), lambda i, j: (i, 0)),
            scratch_shapes=[
                pltpu.VMEM((tile_q, 1), jnp.float32),      # running max
                pltpu.VMEM((tile_q, f_pad), jnp.float32),  # accumulator (+denom col)
            ],
        ),
        compiler_params=pltpu.CompilerParams(
            dimension_semantics=("parallel", "arbitrary")),
    )(h_bf16, s_src, s_dst, adj_i8)

    return out_p[:n, :f_out]


# --------------------------------------------------------------------------
# NumPy reference mirroring the PyTorch sparse formulation exactly
# --------------------------------------------------------------------------
def sparse_reference(x, weight, a, adj_dense):
    x = np.asarray(x, np.float32)
    weight = np.asarray(weight, np.float32)
    a = np.asarray(a, np.float32)
    adj = np.asarray(adj_dense, np.float32)
    n = x.shape[0]
    src, dst = np.nonzero(adj)                          # edge[0], edge[1]

    h = x @ weight                                      # (N, F_out)
    edge_h = np.concatenate([h[src], h[dst]], axis=1)   # (E, 2F)
    alpha = edge_h @ a[0]                               # (E,)
    alpha = np.where(alpha >= 0, alpha, LEAKY_ALPHA * alpha)

    # sparse softmax grouped by src
    seg_max = np.full(n, -np.inf, np.float32)
    np.maximum.at(seg_max, src, alpha)
    expv = np.exp(alpha - seg_max[src])
    seg_sum = np.zeros(n, np.float32)
    np.add.at(seg_sum, src, expv)
    alpha = expv / (seg_sum[src] + EPS)

    # spmm
    out = np.zeros((n, h.shape[1]), np.float32)
    np.add.at(out, src, alpha[:, None] * h[dst])
    return out


if __name__ == "__main__":
    # N deliberately not a multiple of the tile so padding is exercised.
    N, F_IN, F_OUT = 200, 32, 16

    key = jax.random.PRNGKey(0)
    k_x, k_adj, k_w, k_a = jax.random.split(key, 4)

    # node features
    x = jax.random.normal(k_x, (N, F_IN), dtype=jnp.float32)

    # sparse adjacency (as dense 0/1 mask) with self-loops (every row non-empty)
    adj_dense = (jax.random.uniform(k_adj, (N, N)) < 0.1).astype(jnp.float32)
    adj_dense = jnp.maximum(adj_dense, jnp.eye(N, dtype=jnp.float32))

    # deterministic parameter init replicating the `_adj is not None` branch:
    #   stdv = N / sqrt(sum((d_i+1)*(d_j+1)) * 3);  uniform(-stdv, stdv)
    d_i = jnp.sum(adj_dense, axis=1, keepdims=True) + 1.0   # (N, 1)
    d_j = jnp.sum(adj_dense, axis=0, keepdims=True) + 1.0   # (1, N)
    stdv = N / jnp.sqrt(jnp.sum(d_i * d_j) * 3.0)
    weight = jax.random.uniform(
        k_w, (F_IN, F_OUT), minval=-stdv, maxval=stdv, dtype=jnp.float32
    )
    a = jax.random.uniform(
        k_a, (1, 2 * F_OUT), minval=-stdv, maxval=stdv, dtype=jnp.float32
    )

    ref = sparse_reference(x, weight, a, adj_dense)

    # bf16 h / bf16 p on the MXU -> expected ~0.5-1% quantization error vs f32 ref
    RTOL, ATOL = 2e-2, 2e-3

    # default (large) tiles: clamped to the small graph automatically
    out_big = jax.block_until_ready(gat_onehead_forward(x, weight, a, adj_dense))
    np.testing.assert_allclose(np.asarray(out_big), ref, rtol=RTOL, atol=ATOL)

    # small tiles: exercises the multi-col-tile online-softmax path explicitly
    out_small = jax.block_until_ready(
        gat_onehead_forward(x, weight, a, adj_dense, tile_q=128, tile_k=128))
    np.testing.assert_allclose(np.asarray(out_small), ref, rtol=RTOL, atol=ATOL)

    print("KERNEL_OK")
</pallas_src>

<mosaic_0001>
module attributes {stable_mosaic.version = 11 : i64} {
  func.func @prep_kernel(%arg0: i32, %arg1: memref<128x32xf32, #tpu.memory_space<vmem>>, %arg2: memref<32x128xf32, #tpu.memory_space<vmem>>, %arg3: memref<1x128xf32, #tpu.memory_space<vmem>>, %arg4: memref<1x128xf32, #tpu.memory_space<vmem>>, %arg5: memref<128x128xbf16, #tpu.memory_space<vmem>>, %arg6: memref<128x1xf32, #tpu.memory_space<vmem>>, %arg7: memref<1x128xf32, #tpu.memory_space<vmem>>) attributes {dimension_semantics = [#tpu.dimension_semantics<parallel>], iteration_bounds = array<i64: 2>, scalar_prefetch = 0 : i64, scratch_operands = 0 : i64, tpu.core_type = #tpu.core_type<tc>, window_params = [{transform_indices = @transform_0, window_bounds = array<i64: 128, 32>}, {pipeline_mode = #tpu.pipeline_mode<synchronous>, transform_indices = @transform_1, window_bounds = array<i64: 32, 128>}, {pipeline_mode = #tpu.pipeline_mode<synchronous>, transform_indices = @transform_2, window_bounds = array<i64: 1, 128>}, {pipeline_mode = #tpu.pipeline_mode<synchronous>, transform_indices = @transform_3, window_bounds = array<i64: 1, 128>}, {transform_indices = @transform_4, window_bounds = array<i64: 128, 128>}, {transform_indices = @transform_5, window_bounds = array<i64: 128, 1>}, {transform_indices = @transform_6, window_bounds = array<i64: 1, 128>}]} {
    %c0 = arith.constant 0 : index
    %c0_0 = arith.constant 0 : index
    %0 = vector.load %arg1[%c0, %c0_0] : memref<128x32xf32, #tpu.memory_space<vmem>>, vector<128x32xf32>
    %c0_1 = arith.constant 0 : index
    %c0_2 = arith.constant 0 : index
    %1 = vector.load %arg2[%c0_1, %c0_2] : memref<32x128xf32, #tpu.memory_space<vmem>>, vector<32x128xf32>
    %cst = arith.constant dense<0.000000e+00> : vector<128x128xf32>
    %2 = tpu.matmul %0, %1, %cst {dimension_numbers = #tpu.dot_dimension_numbers<[1], [0], [0], [1], [0, 0, 1, 1], [], []>} : vector<128x32xf32>, vector<32x128xf32>, vector<128x128xf32> -> vector<128x128xf32>
    %c0_3 = arith.constant 0 : index
    %c0_4 = arith.constant 0 : index
    %3 = vector.load %arg3[%c0_3, %c0_4] : memref<1x128xf32, #tpu.memory_space<vmem>>, vector<1x128xf32>
    %4 = vector.broadcast %3 : vector<1x128xf32> to vector<128x128xf32>
    %5 = arith.mulf %2, %4 : vector<128x128xf32>
    %cst_5 = arith.constant dense<0.000000e+00> : vector<128xf32>
    %6 = vector.multi_reduction <add>, %5, %cst_5 [1] : vector<128x128xf32> to vector<128xf32>
    %7 = vector.shape_cast %6 : vector<128xf32> to vector<128x1xf32>
    %c0_6 = arith.constant 0 : index
    %c0_7 = arith.constant 0 : index
    %8 = vector.load %arg6[%c0_6, %c0_7] : memref<128x1xf32, #tpu.memory_space<vmem>>, vector<128x1xf32>
    tpu.vector_store %arg6[%c0_6, %c0_7], %7 {strides = array<i32>} : memref<128x1xf32, #tpu.memory_space<vmem>>, vector<128x1xf32>,
    %c0_8 = arith.constant 0 : index
    %c0_9 = arith.constant 0 : index
    %9 = vector.load %arg4[%c0_8, %c0_9] : memref<1x128xf32, #tpu.memory_space<vmem>>, vector<1x128xf32>
    %10 = vector.broadcast %9 : vector<1x128xf32> to vector<128x128xf32>
    %11 = arith.mulf %2, %10 : vector<128x128xf32>
    %cst_10 = arith.constant dense<0.000000e+00> : vector<128xf32>
    %12 = vector.multi_reduction <add>, %11, %cst_10 [1] : vector<128x128xf32> to vector<128xf32>
    %13 = vector.shape_cast %12 : vector<128xf32> to vector<128x1xf32>
    %14 = tpu.transpose %13, [1, 0] : vector<128x1xf32> -> vector<1x128xf32>
    %c0_11 = arith.constant 0 : index
    %c0_12 = arith.constant 0 : index
    %15 = vector.load %arg7[%c0_11, %c0_12] : memref<1x128xf32, #tpu.memory_space<vmem>>, vector<1x128xf32>
    tpu.vector_store %arg7[%c0_11, %c0_12], %14 {strides = array<i32>} : memref<1x128xf32, #tpu.memory_space<vmem>>, vector<1x128xf32>,
    %16 = tpu.iota {dimensions = array<i32: 1>} : vector<128x128xi32>
    %c16_i32 = arith.constant 16 : i32
    %17 = vector.broadcast %c16_i32 : i32 to vector<128x128xi32>
    %18 = arith.cmpi eq, %16, %17 : vector<128x128xi32>
    %cst_13 = arith.constant 1.000000e+00 : f32
    %19 = vector.broadcast %cst_13 : f32 to vector<128x128xf32>
    %20 = arith.select %18, %19, %2 : vector<128x128xi1>, vector<128x128xf32>
    %21 = arith.truncf %20 : vector<128x128xf32> to vector<128x128xbf16>
    %c0_14 = arith.constant 0 : index
    %c0_15 = arith.constant 0 : index
    %22 = vector.load %arg5[%c0_14, %c0_15] : memref<128x128xbf16, #tpu.memory_space<vmem>>, vector<128x128xbf16>
    tpu.vector_store %arg5[%c0_14, %c0_15], %21 {strides = array<i32>} : memref<128x128xbf16, #tpu.memory_space<vmem>>, vector<128x128xbf16>,
    return
  }
  func.func @transform_0(%arg0: i32) -> (i32, i32) {
    %c0_i32 = arith.constant 0 : i32
    %c0_i32_0 = arith.constant 0 : i32
    return %arg0, %c0_i32 : i32, i32
  }
  func.func @transform_1(%arg0: i32) -> (i32, i32) {
    %c0_i32 = arith.constant 0 : i32
    %c0_i32_0 = arith.constant 0 : i32
    %c0_i32_1 = arith.constant 0 : i32
    return %c0_i32, %c0_i32_0 : i32, i32
  }
  func.func @transform_2(%arg0: i32) -> (i32, i32) {
    %c0_i32 = arith.constant 0 : i32
    %c0_i32_0 = arith.constant 0 : i32
    %c0_i32_1 = arith.constant 0 : i32
    return %c0_i32, %c0_i32_0 : i32, i32
  }
  func.func @transform_3(%arg0: i32) -> (i32, i32) {
    %c0_i32 = arith.constant 0 : i32
    %c0_i32_0 = arith.constant 0 : i32
    %c0_i32_1 = arith.constant 0 : i32
    return %c0_i32, %c0_i32_0 : i32, i32
  }
  func.func @transform_4(%arg0: i32) -> (i32, i32) {
    %c0_i32 = arith.constant 0 : i32
    %c0_i32_0 = arith.constant 0 : i32
    return %arg0, %c0_i32 : i32, i32
  }
  func.func @transform_5(%arg0: i32) -> (i32, i32) {
    %c0_i32 = arith.constant 0 : i32
    %c0_i32_0 = arith.constant 0 : i32
    return %arg0, %c0_i32 : i32, i32
  }
  func.func @transform_6(%arg0: i32) -> (i32, i32) {
    %c0_i32 = arith.constant 0 : i32
    %c0_i32_0 = arith.constant 0 : i32
    return %c0_i32, %arg0 : i32, i32
  }
}

</mosaic_0001>

<bundles_post_ra>
// kernel: tpu_custom_call.1
= control target key start
LH: loop header
LB: loop body
LE: loop exit
PB: predicated region body
PF: predicated region fallthrough
CT: control target
= control target key end

     0   :  { %12 = vsyncpa [#allocation3], 0  ;;  %s1638_s0 = inlined_call_operand.vmem [shape: f32[256,32], index: 0, kind: input, shape index: {}]   ;;  %s1639_s1 = inlined_call_operand.vmem [shape: f32[32,128], index: 1, kind: input, shape index: {}]   ;;  %s1640_s2 = inlined_call_operand.vmem [shape: f32[1,128], index: 2, kind: input, shape index: {}]   ;;  %s1641_s3 = inlined_call_operand.vmem [shape: f32[1,128], index: 3, kind: input, shape index: {}]   ;;  %s1642_s4 = inlined_call_operand.hbm [shape: bf16[256,128], index: 4, kind: output, shape index: {0}]   ;;  %s1643_s5 = inlined_call_operand.vmem [shape: f32[256,1], index: 5, kind: output, shape index: {1}]   ;;  %s1644_s6 = inlined_call_operand.hbm [shape: f32[1,256], index: 6, kind: output, shape index: {2}]  }
   0x1   :  { %14 = vsyncpa [#allocation3 + $0x1], 0 }
   0x2   :  { %15 = vsyncpa [#allocation5], 0 }
   0x3   :  { %17 = vsyncpa [#allocation5 + $0x1], 0  ;;  %s1262_s21 = smov 0   ;;  %s1264_s22 = smov 0  }
   0x4   :  { %s1266_s23 = smov 0   ;;  %s1268_s24 = smov 0  }
   0x5 LB: > { %s1283_s25 = sadd.s32 4294967295, %s1221_s24   ;;  %s904_s26 = sadd.s32 4294967294, %s1221_s24   ;;  %s1221_s24 = sphi %s1268_s24, %s1650_s24   ;;  %s1217_s23 = sphi %s1266_s23, %s1649_s23   ;;  %s1213_s22 = sphi %s1264_s22, %s1648_s22   ;;  %s1209_s21 = sphi %s1262_s21, %s1647_s21  }
   0x6   : > { %s1287_s27 = sadd.s32 1, %s1221_s24   ;;  %s119_s28 = sadd.s32 1, %s1217_s23 }
   0x7   : > { %s116_s29 = ssub.s32 %s1221_s24, %s1287_s27  ;;  %p129_p0 = scmp.ne.s32.totalorder %s1217_s23, %s1213_s22 }
   0x8   : > { %p117_p1 = scmp.eq.s32.totalorder %s116_s29, 0  ;;  %p130_p2 = scmp.eq.s32.totalorder %s1283_s25, 1 }
   0x9   : > { %p135_p3 = scmp.ne.s32.totalorder %s1213_s22, %s1209_s21  ;;  %p136_p4 = scmp.eq.s32.totalorder %s904_s26, 1 }
   0xa   : > { %s1298_s30 = scalar_select %p117_p1, %s1217_s23, %s119_s28  }
   0xb   : > { %p1300_p5 = por %p130_p2, %p129_p0  ;;  %p1304_p6 = por %p136_p4, %p135_p3 }
   0xc   : > { %p907_p7 = scmp.ge.s32.totalorder %s1221_s24, 1  ;;  %p224_p8 = scmp.lt.s32.totalorder %s1221_s24, 3 }
   0xe   : > { %p225_p9 = pnand %p907_p7, %p224_p8 }
   0xf   : > { %v292_v0 = vld [vmem:[%s1639_s1] sm:$0xff] (!%p225_p9)  ;;  %v293_v1 = vld [vmem:[%s1639_s1 + $0x8] sm:$0xff] (!%p225_p9)  ;;  %v294_v2 = vld [vmem:[%s1639_s1 + $0x10] sm:$0xff] (!%p225_p9)  ;;  %s1320_s15 = sshll.u32 (!%p225_p9), %s1283_s25, 4  ;;  %vm296_vm0 = vcmask (!%p225_p9), 261120   ;;  %v650_v22 = vlaneseq (!%p225_p9)  ;;  %s1372_s29 = sand.u32 (!%p225_p9), 1, %s1213_s22  }
  0x10   : > { %228 = sbr.rel (%p225_p9) target bundleno = 562 (0x232), region = 36  ;;  %v1069_v3 = vpack.c.bf16 (!%p225_p9), %v293_v1, %v292_v0  ;;  %v295_v4 = vld [vmem:[%s1639_s1 + $0x18] sm:$0xff] (!%p225_p9)  ;;  %p264_p10 = scmp.lt.s32.totalorder (!%p225_p9), %s1320_s15, 31  ;;  %v1378_v24 = vld [vmem:[%s1641_s3] ss:$0 sm:$0xff] (!%p225_p9)  ;;  %vm545_vm2 = vcmask (!%p225_p9), 7168  }
  0x11   : > { %v1073_v5 = vpack.c.bf16 (!%p225_p9), %v295_v4, %v294_v2  ;;  %v1369_v23 = vand.u32 (!%p225_p9), 127, %v650_v22  ;;  %s908_s11 = sshll.u32 (!%p225_p9), %s1372_s29, 6  ;;  %s969_s26 = sshll.u32 (!%p225_p9), %s1283_s25, 10 }
  0x12   : > { %1070 = vmatprep.subr.bf16.mxu0 (!%p225_p9), %v1069_v3  ;;  %1077 = vmatprep.subr.bf16.mxu1 (!%p225_p9), %v1069_v3  ;;  %s1412_s12 = scalar_lea.vmem (!%p225_p9), [#allocation2], %s908_s11  ;;  %s1223_s25 = smov (!%p225_p9), [#allocation2]  }
  0x13   : > { %1072 = vmatpush3.bf16.msra.mxu0 (!%p225_p9), %v1069_v3  ;;  %1079 = vmatpush3.bf16.msra.mxu1 (!%p225_p9), %v1069_v3  ;;  %vm652_vm1 = vcmp.eq.s32.totalorder (!%p225_p9), %v1369_v23, 16  ;;  %s772_s10 = sshll.u32 (!%p225_p9), %s1412_s12, 4  ;;  %s1131_s13 = sshll.u32 (!%p225_p9), %s1223_s25, 4  ;;  %s1529_s10 = int_to_ptr.vmem [resolvable:$true] %s772_s10  ;;  %s1132_s13 = int_to_ptr.vmem [resolvable:$false] %s1131_s13 }
  0x14   : > { %1074 = vmatprep.subr.bf16.mxu0 (!%p225_p9), %v1073_v5  ;;  %1078 = vmatprep.subr.bf16.mxu1 (!%p225_p9), %v1073_v5  ;;  %s1127_s11 = scalar_lea.vmem (!%p225_p9), %s1529_s10, 1024  ;;  %s1133_s14 = scalar_lea.vmem (!%p225_p9), %s1132_s13, 2048 }
  0x15   : > { %p1128_p11 = scmp.ne.s32.totalorder (!%p225_p9), %s1529_s10, %s1127_s11  ;;  %p1134_p0 = scmp.lt.s32.totalorder (!%p225_p9), %s1529_s10, %s1132_s13 }
  0x16   : > { %p1135_p1 = scmp.lt.s32.totalorder (!%p225_p9), %s1133_s14, %s1127_s11 }
  0x17   : > { %s1327_s18 = scalar_select %p264_p10, %s1320_s15, 31  ;;  %1076 = vmatpush3.bf16.msra.mxu0 %v1073_v5  ;;  %1080 = vmatpush3.bf16.msra.mxu1 %v1073_v5 }
  0x18   : > { %p1129_p12 = pnand %p1128_p11, %p1300_p5  ;;  %p1136_p2 = por %p1135_p1, %p1134_p0 }
  0x19   : > { %s910_s19 = sshll.u32 %s1327_s18, 3  ;;  %s1522_s18 = scalar_lea.hbm %s1642_s4, %s969_s26 }
  0x1a   : > { %s1335_s28 = scalar_lea.vmem %s1638_s0, %s910_s19  ;;  %s1512_s20 = scalar_lea.vmem %s1643_s5, %s910_s19 }
  0x1b   : > { %v276_v6 = vld [vmem:[%s1335_s28] sm:$0xff]  ;;  %v277_v7 = vld [vmem:[%s1335_s28 + $0x8] sm:$0xff]  ;;  %v278_v9 = vld [vmem:[%s1335_s28 + $0x10] sm:$0xff]  ;;  %s750_s19 = scalar_lea.sflag [#allocation3], %s1372_s29  ;;  %p1130_p13 = pneg %p1129_p12 }
  0x1c   : > { %1045 = vmatprep.mubr.msk.f32.mxu0 %vm296_vm0, %v276_v6  ;;  %v284_v8 = vld [vmem:[%s1335_s28 + $0x40] sm:$0xff]  ;;  %v285_v10 = vld [vmem:[%s1335_s28 + $0x48] sm:$0xff]  ;;  %v286_v11 = vld [vmem:[%s1335_s28 + $0x50] sm:$0xff] }
  0x1d   : > { %1057 = vmatprep.mubr.msk.f32.mxu1 %vm296_vm0, %v284_v8  ;;  %1046 = vmatmul.mubr.msk.f32.vlgmr.msra.gmra.mrb[0].mxu0 %vm296_vm0, %v277_v7  ;;  %v279_v12 = vld [vmem:[%s1335_s28 + $0x18] sm:$0xff]  ;;  %v280_v13 = vld [vmem:[%s1335_s28 + $0x20] sm:$0xff]  ;;  %v281_v16 = vld [vmem:[%s1335_s28 + $0x28] sm:$0xff]  ;;  %p1137_p3 = pnand %p1136_p2, %p1130_p13 }
  0x1e   : > { %1048 = vmatprep.mubr.msk.f32.mxu0 %vm296_vm0, %v278_v9  ;;  %1058 = vmatmul.mubr.msk.f32.vlgmr.msra.gmra.mrb[0].mxu1 %vm296_vm0, %v285_v10  ;;  %v287_v14 = vld [vmem:[%s1335_s28 + $0x58] sm:$0xff]  ;;  %v288_v15 = vld [vmem:[%s1335_s28 + $0x60] sm:$0xff]  ;;  %v282_v17 = vld [vmem:[%s1335_s28 + $0x30] sm:$0xff] }
  0x1f   : > { %1060 = vmatprep.mubr.msk.f32.mxu1 %vm296_vm0, %v286_v11  ;;  %v289_v18 = vld [vmem:[%s1335_s28 + $0x68] sm:$0xff]  ;;  %v290_v19 = vld [vmem:[%s1335_s28 + $0x70] sm:$0xff]  ;;  %v283_v20 = vld [vmem:[%s1335_s28 + $0x38] sm:$0xff] }
  0x20   : > { %v291_v21 = vld [vmem:[%s1335_s28 + $0x78] sm:$0xff] }
  0x21   : > { %1049 = vmatmul.mubr.msk.f32.gmra.mrb[2].mxu0 %vm296_vm0, %v279_v12  ;;  %v929_v12 = vld [vmem:[%s1640_s2] ss:$0 sm:$0xff] }
  0x22   : > { %1051 = vmatprep.mubr.msk.f32.mxu0 %vm296_vm0, %v280_v13  ;;  %1061 = vmatmul.mubr.msk.f32.gmra.mrb[2].mxu1 %vm296_vm0, %v287_v14 }
  0x23   : > { %1063 = vmatprep.mubr.msk.f32.mxu1 %vm296_vm0, %v288_v15 }
  0x25   : > { %1052 = vmatmul.mubr.msk.f32.gmra.mrb[4].mxu0 %vm296_vm0, %v281_v16 }
  0x26   : > { %1054 = vmatprep.mubr.msk.f32.mxu0 %vm296_vm0, %v282_v17  ;;  %1064 = vmatmul.mubr.msk.f32.gmra.mrb[4].mxu1 %vm296_vm0, %v289_v18 }
  0x27   : > { %1066 = vmatprep.mubr.msk.f32.mxu1 %vm296_vm0, %v290_v19 }
  0x29   : > { %1055 = vmatmul.mubr.msk.f32.gmra.mrb[6].mxu0 %vm296_vm0, %v283_v20 }
  0x2a   : > { %1067 = vmatmul.mubr.msk.f32.gmra.mrb[6].mxu1 %vm296_vm0, %v291_v21 }
  0xf0   : > { %v1381_v25 = vpop.f32.mrb[0].mxu0 }
  0xf1   : > { %v654_v26 = vsel %vm652_vm1, 1.0, %v1381_v25  ;;  %v1386_v27 = vpop.f32.mrb[1].mxu0  ;;  %v570_v28 = vmul.f32 %v1381_v25, %v1378_v24  ;;  %v1390_v29 = vpop.f32.mrb[0].mxu1  ;;  %v498_v20 = vmul.f32 %v1381_v25, %v929_v12 }
  0xf2   : > { %v653_v30 = vsel %vm652_vm1, 1.0, %v1386_v27  ;;  %v662_v31 = vsel %vm652_vm1, 1.0, %v1390_v29  ;;  %v1398_v32 = vpop.f32.mrb[1].mxu1  ;;  %v569_v39 = vmul.f32 %v1378_v24, %v1386_v27  ;;  %v578_v11 = vmul.f32 %v1390_v29, %v1378_v24 }
  0xf3   : > { %v973_v33 = vpack.c.bf16 %v654_v26, %v653_v30  ;;  %587 = vadd.xlane.f32.xlu0 %v570_v28  ;;  %v661_v34 = vsel %vm652_vm1, 1.0, %v1398_v32  ;;  %v577_v46 = vmul.f32 %v1378_v24, %v1398_v32  ;;  %v497_v13 = vmul.f32 %v929_v12, %v1386_v27 }
  0xf4   : > { %v1403_v35 = vpop.f32.mrb[2].mxu0  ;;  %v993_v36 = vpack.c.bf16 %v662_v31, %v661_v34  ;;  %v505_v19 = vmul.f32 %v929_v12, %v1398_v32  ;;  %v506_v28 = vmul.f32 %v1390_v29, %v929_v12 }
  0xf5   : > { %v656_v37 = vsel %vm652_vm1, 1.0, %v1403_v35  ;;  %v421_v38 = vpop.f32.mrb[3].mxu0  ;;  %v1410_v40 = vpop.f32.mrb[2].mxu1  ;;  %974 = vst [vmem:[%s1412_s12] sm:$0xff] %v973_v33   ;;  %v572_v54 = vmul.f32 %v1403_v35, %v1378_v24  ;;  %v500_v22 = vmul.f32 %v1403_v35, %v929_v12 }
  0xf6   : > { %v655_v41 = vsel %vm652_vm1, 1.0, %v421_v38  ;;  %v571_v42 = vmul.f32 %v1378_v24, %v421_v38  ;;  %v664_v43 = vsel %vm652_vm1, 1.0, %v1410_v40  ;;  %v1421_v44 = vpop.f32.mrb[3].mxu1  ;;  %1013 = vst [vmem:[%s1412_s12 + $0x20] sm:$0xff] %v993_v36   ;;  %v580_v14 = vmul.f32 %v1410_v40, %v1378_v24 }
  0xf7   : > { %v978_v45 = vpack.c.bf16 %v656_v37, %v655_v41  ;;  %585 = vadd.xlane.f32.xlu0 %v569_v39  ;;  %v663_v47 = vsel %vm652_vm1, 1.0, %v1421_v44  ;;  %v579_v5 = vmul.f32 %v1378_v24, %v1421_v44  ;;  %v499_v15 = vmul.f32 %v929_v12, %v421_v38 }
  0xf8   : > { %589 = vadd.xlane.f32.xlu1 %v571_v42  ;;  %v1429_v48 = vpop.f32.mrb[4].mxu0  ;;  %v998_v49 = vpack.c.bf16 %v664_v43, %v663_v47  ;;  %v507_v21 = vmul.f32 %v929_v12, %v1421_v44  ;;  %v508_v30 = vmul.f32 %v1410_v40, %v929_v12 }
  0xf9   : > { %v658_v50 = vsel %vm652_vm1, 1.0, %v1429_v48  ;;  %v431_v51 = vpop.f32.mrb[5].mxu0  ;;  %v1434_v52 = vpop.f32.mrb[4].mxu1  ;;  %1010 = vst [vmem:[%s1412_s12 + $0x8] sm:$0xff] %v978_v45   ;;  %v574_v1 = vmul.f32 %v1429_v48, %v1378_v24  ;;  %v502_v26 = vmul.f32 %v1429_v48, %v929_v12 }
  0xfa   : > { %v657_v53 = vsel %vm652_vm1, 1.0, %v431_v51  ;;  %v666_v55 = vsel %vm652_vm1, 1.0, %v1434_v52  ;;  %v471_v56 = vpop.f32.mrb[5].mxu1  ;;  %1014 = vst [vmem:[%s1412_s12 + $0x28] sm:$0xff] %v998_v49   ;;  %v573_v58 = vmul.f32 %v1378_v24, %v431_v51  ;;  %v582_v16 = vmul.f32 %v1434_v52, %v1378_v24 }
  0xfb   : > { %601 = vadd.xlane.f32.xlu0 %v577_v46  ;;  %v983_v57 = vpack.c.bf16 %v658_v50, %v657_v53  ;;  %v665_v59 = vsel %vm652_vm1, 1.0, %v471_v56  ;;  %v581_v10 = vmul.f32 %v1378_v24, %v471_v56  ;;  %v501_v18 = vmul.f32 %v929_v12, %v431_v51 }
  0xfc   : > { %591 = vadd.xlane.f32.xlu1 %v572_v54  ;;  %v1448_v60 = vpop.f32.mrb[6].mxu0  ;;  %v1003_v61 = vpack.c.bf16 %v666_v55, %v665_v59  ;;  %v509_v23 = vmul.f32 %v929_v12, %v471_v56  ;;  %v510_v32 = vmul.f32 %v1434_v52, %v929_v12 }
  0xfd   : > { %v660_v62 = vsel %vm652_vm1, 1.0, %v1448_v60  ;;  %v1453_v63 = vpop.f32.mrb[6].mxu1  ;;  %v441_v0 = vpop.f32.mrb[7].mxu0  ;;  %1011 = vst [vmem:[%s1412_s12 + $0x10] sm:$0xff] %v983_v57   ;;  %v576_v8 = vmul.f32 %v1448_v60, %v1378_v24  ;;  %v504_v34 = vmul.f32 %v1448_v60, %v929_v12 }
  0xfe   : > { %v668_v2 = vsel %vm652_vm1, 1.0, %v1453_v63  ;;  %v659_v3 = vsel %vm652_vm1, 1.0, %v441_v0  ;;  %1015 = vst [vmem:[%s1412_s12 + $0x30] sm:$0xff] %v1003_v61   ;;  %v481_v4 = vpop.f32.mrb[7].mxu1  ;;  %v584_v17 = vmul.f32 %v1453_v63, %v1378_v24  ;;  %v575_v27 = vmul.f32 %v1378_v24, %v441_v0 }
  0xff   : > { %593 = vadd.xlane.f32.xlu0 %v573_v58  ;;  %v988_v6 = vpack.c.bf16 %v660_v62, %v659_v3  ;;  %v667_v7 = vsel %vm652_vm1, 1.0, %v481_v4  ;;  %v583_v25 = vmul.f32 %v1378_v24, %v481_v4  ;;  %v503_v31 = vmul.f32 %v929_v12, %v441_v0 }
 0x100   : > { %595 = vadd.xlane.f32.xlu1 %v574_v1  ;;  %v1008_v9 = vpack.c.bf16 %v668_v2, %v667_v7  ;;  %v511_v33 = vmul.f32 %v929_v12, %v481_v4  ;;  %v512_v29 = vmul.f32 %v1453_v63, %v929_v12 }
 0x101   : > { %1012 = vst [vmem:[%s1412_s12 + $0x18] sm:$0xff] %v988_v6  }
 0x102   : > { %1016 = vst [vmem:[%s1412_s12 + $0x38] sm:$0xff] %v1008_v9  }
 0x103   : > { %605 = vadd.xlane.f32.xlu0 %v579_v5 }
 0x104   : > { %599 = vadd.xlane.f32.xlu1 %v576_v8 }
 0x107   : > { %609 = vadd.xlane.f32.xlu0 %v581_v10 }
 0x108   : > { %603 = vadd.xlane.f32.xlu1 %v578_v11 }
 0x10b   : > { %513 = vadd.xlane.f32.xlu0 %v497_v13 }
 0x10c   : > { %607 = vadd.xlane.f32.xlu1 %v580_v14 }
 0x10f   : > { %517 = vadd.xlane.f32.xlu0 %v499_v15 }
 0x110   : > { %611 = vadd.xlane.f32.xlu1 %v582_v16 }
 0x113   : > { %521 = vadd.xlane.f32.xlu0 %v501_v18 }
 0x114   : > { %615 = vadd.xlane.f32.xlu1 %v584_v17 }
 0x117   : > { %529 = vadd.xlane.f32.xlu0 %v505_v19 }
 0x118   : > { %515 = vadd.xlane.f32.xlu1 %v498_v20 }
 0x11b   : > { %533 = vadd.xlane.f32.xlu0 %v507_v21 }
 0x11c   : > { %519 = vadd.xlane.f32.xlu1 %v500_v22 }
 0x11f   : > { %537 = vadd.xlane.f32.xlu0 %v509_v23 }
 0x120   : > { %523 = vadd.xlane.f32.xlu1 %v502_v26 }
 0x123   : > { %597 = vadd.xlane.f32.xlu0 %v575_v27 }
 0x124   : > { %531 = vadd.xlane.f32.xlu1 %v506_v28 }
 0x127   : > { %613 = vadd.xlane.f32.xlu0 %v583_v25 }
 0x128   : > { %535 = vadd.xlane.f32.xlu1 %v508_v30 }
 0x12b   : > { %525 = vadd.xlane.f32.xlu0 %v503_v31 }
 0x12c   : > { %539 = vadd.xlane.f32.xlu1 %v510_v32 }
 0x12f   : > { %541 = vadd.xlane.f32.xlu0 %v511_v33 }
 0x130   : > { %527 = vadd.xlane.f32.xlu1 %v504_v34 }
 0x134   : > { %543 = vadd.xlane.f32.xlu1 %v512_v29 }
 0x180   : > { %v588_v35 = vpop.xlane.xlu0 %587 }
 0x184   : > { %v586_v24 = vpop.xlane.xlu0 %585 }
 0x185   : > { %v590_v36 = vpop.xlane.xlu1 %589  ;;  %617 = vxpose.xlu0.b32.start [1/16] (narrow) %v586_v24, 8 }
 0x188   : > { %v1497_v37 = vpop.xlane.xlu0 %601 }
 0x189   : > { %v592_v38 = vpop.xlane.xlu1 %591  ;;  %618 = vxpose.xlu0.b32.cont [2/16] (narrow) %v588_v35, 8 }
 0x18c   : > { %v594_v39 = vpop.xlane.xlu0 %593 }
 0x18d   : > { %v596_v40 = vpop.xlane.xlu1 %595  ;;  %619 = vxpose.xlu0.b32.cont [3/16] (narrow) %v590_v36, 8 }
 0x190   : > { %v1499_v41 = vpop.xlane.xlu0 %605 }
 0x191   : > { %v1501_v42 = vpop.xlane.xlu1 %599  ;;  %620 = vxpose.xlu0.b32.cont [4/16] (narrow) %v592_v38, 8 }
 0x194   : > { %v1503_v43 = vpop.xlane.xlu0 %609 }
 0x195   : > { %v1505_v44 = vpop.xlane.xlu1 %603  ;;  %621 = vxpose.xlu0.b32.cont [5/16] (narrow) %v594_v39, 8 }
 0x198   : > { %v514_v45 = vpop.xlane.xlu0 %513 }
 0x199   : > { %546 = vst.msk [vmem:[%s1512_s20] sm:$0xff] %vm545_vm2, %v514_v45  ;;  %v1516_v46 = vpop.xlane.xlu1 %607  ;;  %622 = vxpose.xlu0.b32.cont [6/16] (narrow) %v596_v40, 8 }
 0x19c   : > { %v518_v47 = vpop.xlane.xlu0 %517 }
 0x19d   : > { %548 = vst.msk [vmem:[%s1512_s20 + $0x10] sm:$0xff] %vm545_vm2, %v518_v47  ;;  %v1527_v48 = vpop.xlane.xlu1 %611 }
 0x19e   : > { %1140 = shalt.err (!%p1137_p3)
}
 0x19f   : > { %s1141_s12 = scalar_lea.hbm %s1522_s18, 1024  ;;  %s1145_s26 = scalar_lea.hbm %s1642_s4, 2048 }
 0x1a0   : > { %p1142_p4 = scmp.ne.s32.totalorder %s1522_s18, %s1141_s12  ;;  %p1146_p9 = scmp.lt.u32.totalorder %s1522_s18, %s1642_s4 }
 0x1a1   : > { %p1147_p10 = scmp.lt.u32.totalorder %s1145_s26, %s1141_s12  ;;  %p1149_p12 = scmp.lt.u32.totalorder %s1141_s12, %s1522_s18 }
 0x1a2   : > { %p1143_p7 = pnand %p1142_p4, %p1300_p5 }
 0x1a3   : > { %p1148_p11 = por %p1147_p10, %p1146_p9 }
 0x1a4   : > { %p1144_p8 = pneg %p1143_p7 }
 0x1a5   : > { %p1150_p13 = por %p1149_p12, %p1148_p11 }
 0x1a7   : > { %p1151_p0 = pnand %p1150_p13, %p1144_p8 }
 0x1a9   : > { %1154 = shalt.err (!%p1151_p0)
}
 0x1aa   : > { %s1224_s11 = smov 64   ;;  %s1225_s25 = smov 4   ;;  %v522_v49 = vpop.xlane.xlu0 %521  ;;  %v616_v50 = vpop.xlane.xlu1 %615 }
 0x1ab   : > { %1081 = dma.vmem_to_hbm [thread:$0]  (%p1300_p5), %s1529_s10, 1024, %s1522_s18, %s750_s19, %s1224_s11, %s1224_s11, %s1225_s25  }
 0x1ac   : > { %550 = vst.msk [vmem:[%s1512_s20 + $0x20] sm:$0xff] %vm545_vm2, %v522_v49  ;;  %s262_s18 = scalar_lea.vmem [#allocation4], %s1372_s29  ;;  %s1597_s14 = scalar_lea.hbm %s1644_s6, %s1320_s15 }
 0x1ad   : > { %s792_s10 = sshll.u32 %s262_s18, 4  ;;  %s1226_s16 = smov [#allocation4]   ;;  %s1591_s10 = int_to_ptr.vmem [resolvable:$true] %s792_s10 }
 0x1ae   : > { %v530_v51 = vpop.xlane.xlu0 %529  ;;  %v516_v52 = vpop.xlane.xlu1 %515  ;;  %s1155_s12 = scalar_lea.vmem %s1591_s10, 16  ;;  %s1159_s17 = sshll.u32 %s1226_s16, 4  ;;  %s1160_s17 = int_to_ptr.vmem [resolvable:$false] %s1159_s17 }
 0x1af   : > { %554 = vst.msk [vmem:[%s1512_s20 + $0x40] sm:$0xff] %vm545_vm2, %v530_v51  ;;  %547 = vst.msk [vmem:[%s1512_s20 + $0x8] sm:$0xff] %vm545_vm2, %v516_v52  ;;  %p1156_p1 = scmp.ne.s32.totalorder %s1591_s10, %s1155_s12  ;;  %s1161_s26 = scalar_lea.vmem %s1160_s17, 32 }
 0x1b0   : > { %p1162_p4 = scmp.lt.s32.totalorder %s1591_s10, %s1160_s17  ;;  %p1163_p7 = scmp.lt.s32.totalorder %s1161_s26, %s1155_s12 }
 0x1b1   : > { %p1157_p2 = pnand %p1156_p1, %p1300_p5 }
 0x1b2   : > { %v534_v53 = vpop.xlane.xlu0 %533  ;;  %v520_v54 = vpop.xlane.xlu1 %519  ;;  %p1164_p8 = por %p1163_p7, %p1162_p4 }
 0x1b3   : > { %556 = vst.msk [vmem:[%s1512_s20 + $0x50] sm:$0xff] %vm545_vm2, %v534_v53  ;;  %549 = vst.msk [vmem:[%s1512_s20 + $0x18] sm:$0xff] %vm545_vm2, %v520_v54  ;;  %p1158_p3 = pneg %p1157_p2 }
 0x1b5   : > { %p1165_p9 = pnand %p1164_p8, %p1158_p3 }
 0x1b6   : > { %v538_v55 = vpop.xlane.xlu0 %537  ;;  %v524_v56 = vpop.xlane.xlu1 %523 }
 0x1b7   : > { %558 = vst.msk [vmem:[%s1512_s20 + $0x60] sm:$0xff] %vm545_vm2, %v538_v55  ;;  %551 = vst.msk [vmem:[%s1512_s20 + $0x28] sm:$0xff] %vm545_vm2, %v524_v56 }
 0x1ba   : > { %v598_v57 = vpop.xlane.xlu0 %597  ;;  %v532_v58 = vpop.xlane.xlu1 %531 }
 0x1bb   : > { %623 = vxpose.xlu0.b32.cont [7/16] (narrow) %v598_v57, 8  ;;  %555 = vst.msk [vmem:[%s1512_s20 + $0x48] sm:$0xff] %vm545_vm2, %v532_v58 }
 0x1be   : > { %v614_v59 = vpop.xlane.xlu0 %613  ;;  %v536_v60 = vpop.xlane.xlu1 %535 }
 0x1bf   : > { %624 = vxpose.xlu0.b32.cont [8/16] (narrow) %v1501_v42, 8  ;;  %557 = vst.msk [vmem:[%s1512_s20 + $0x58] sm:$0xff] %vm545_vm2, %v536_v60 }
 0x1c2   : > { %v526_v61 = vpop.xlane.xlu0 %525  ;;  %v540_v62 = vpop.xlane.xlu1 %539 }
 0x1c3   : > { %552 = vst.msk [vmem:[%s1512_s20 + $0x30] sm:$0xff] %vm545_vm2, %v526_v61  ;;  %625 = vxpose.xlu0.b32.cont [9/16] (narrow) %v1497_v37, 8  ;;  %559 = vst.msk [vmem:[%s1512_s20 + $0x68] sm:$0xff] %vm545_vm2, %v540_v62 }
 0x1c6   : > { %v542_v63 = vpop.xlane.xlu0 %541  ;;  %v528_v0 = vpop.xlane.xlu1 %527 }
 0x1c7   : > { %626 = vxpose.xlu0.b32.cont [10/16] (narrow) %v1505_v44, 8  ;;  %560 = vst.msk [vmem:[%s1512_s20 + $0x70] sm:$0xff] %vm545_vm2, %v542_v63  ;;  %553 = vst.msk [vmem:[%s1512_s20 + $0x38] sm:$0xff] %vm545_vm2, %v528_v0 }
 0x1ca   : > { %v544_v1 = vpop.xlane.xlu1 %543 }
 0x1cb   : > { %627 = vxpose.xlu0.b32.cont [11/16] (narrow) %v1499_v41, 8  ;;  %561 = vst.msk [vmem:[%s1512_s20 + $0x78] sm:$0xff] %vm545_vm2, %v544_v1  ;;  %s760_s20 = scalar_lea.sflag [#allocation5], %s1372_s29 }
 0x1cf   : > { %628 = vxpose.xlu0.b32.cont [12/16] (narrow) %v1516_v46, 8 }
 0x1d3   : > { %629 = vxpose.xlu0.b32.cont [13/16] (narrow) %v1503_v43, 8 }
 0x1d7   : > { %630 = vxpose.xlu0.b32.cont [14/16] (narrow) %v1527_v48, 8 }
 0x1db   : > { %631 = vxpose.xlu0.b32.cont [15/16] (narrow) %v614_v59, 8 }
 0x1df   : > { %632 = vxpose.xlu0.b32.end [16/16] (narrow) %v616_v50, 8 }
 0x223   : > { %v633_v2 = vpop.trf.xlu0 }
 0x224   : > { %649 = vst [vmem:[%s262_s18] sm:$0x1] %v633_v2 }
 0x225   : > { %1168 = shalt.err (!%p1165_p9)
}
 0x226   : > { %s1169_s15 = scalar_lea.hbm %s1597_s14, 16  ;;  %s1173_s9 = scalar_lea.hbm %s1644_s6, 32 }
 0x227   : > { %p1170_p10 = scmp.ne.s32.totalorder %s1597_s14, %s1169_s15  ;;  %p1174_p13 = scmp.lt.u32.totalorder %s1597_s14, %s1644_s6 }
 0x228   : > { %p1175_p0 = scmp.lt.u32.totalorder %s1173_s9, %s1169_s15  ;;  %p1177_p2 = scmp.lt.u32.totalorder %s1169_s15, %s1597_s14 }
 0x229   : > { %p1171_p11 = pnand %p1170_p10, %p1300_p5 }
 0x22a   : > { %p1176_p1 = por %p1175_p0, %p1174_p13 }
 0x22b   : > { %p1172_p12 = pneg %p1171_p11 }
 0x22c   : > { %p1178_p3 = por %p1177_p2, %p1176_p1 }
 0x22e   : > { %p1179_p4 = pnand %p1178_p3, %p1172_p12 }
 0x230   : > { %1182 = shalt.err (!%p1179_p4)
}
 0x231   : > { %1082 = dma.vmem_to_hbm [thread:$0]  (%p1300_p5), %s1591_s10, 16, %s1597_s14, %s760_s20  }
 0x232 PF: > { %p1092_p7 = scmp.ge.s32.totalorder %s1221_s24, 2  ;;  %s804_s18 = sand.u32 1, %s1209_s21  }
 0x233   : > { %s805_s19 = scalar_lea.sflag [#allocation3], %s804_s18 }
 0x234   : > { %p1086_p8 = pnand %p1092_p7, %p1304_p6 }
 0x236   : > { %1200 = dma.done.wait (!%p1086_p8), %s805_s19, 1024  }
 0x237   : > { %1202 = vsyncadd (!%p1086_p8), %s805_s19, 4294966272  ;;  %s822_s13 = scalar_lea.sflag [#allocation5], %s804_s18 }
 0x238   : > { %1204 = dma.done.wait (!%p1086_p8), %s822_s13, 16  }
 0x239   : > { %1206 = vsyncadd (!%p1086_p8), %s822_s13, 4294967280  ;;  %p20_p5 = scmp.ge.s32.totalorder %s1287_s27, 4   ;;  %s1647_s21 = smov %s1213_s22 }
 0x23a   : > { %s1648_s22 = smov %s1217_s23  ;;  %s1649_s23 = smov %s1298_s30 }
 0x23b   : > { %s1650_s24 = smov %s1287_s27  ;;  %22 = sbr.rel (!%p20_p5) target bundleno = 5 (0x5), region = 100 }
 0x242   :  { %826 = vsyncpa [#allocation3], 1 }
 0x243   :  { %828 = vsyncpa [#allocation3 + $0x1], 1 }
 0x244   :  { %829 = vsyncpa [#allocation5], 1 }
 0x245   :  { %831 = vsyncpa [#allocation5 + $0x1], 1 }

</bundles_post_ra>
